<compile_context>
chip_gen: v7x
topology: tpu7x:2x2x1
jax: 0.10.0
libtpu: 0.0.40
codegen_flags: <defaults>
</compile_context>

<pallas_src>
import functools

import jax
import jax.numpy as jnp
from jax import lax
from jax.experimental import pallas as pl
from jax.experimental.pallas import tpu as pltpu

KH = KW = 3
EPS = 1e-5
UPSCALE = 2


def _decoder_block_kernel(x_ref, m_ref, w_ref, bn_ref, o_ref, *, W):
    """One (batch, spatial-tile) grid step.

    x_ref : (1, 1, Cin, TS + 2W + 2) bf16  flat-padded input tile (+halo)
    m_ref : (2, TS)                  bf16  column-validity masks (kw=0, kw=2)
    w_ref : (9, Cmid, Cin)           bf16  conv weights, tap-major
    bn_ref: (Cmid, 4)                f32   columns = [s1, b1, s2, b2]
    o_ref : (1, Cmid, TS)            bf16  conv+BN1+ReLU+BN2'+ReLU (pre-shuffle)
    """
    Cmid = o_ref.shape[1]
    TS = o_ref.shape[2]

    xw = x_ref.at[0, 0]                       # (Cin, TSH) ref view, no copy
    mask = m_ref[...]                         # (2, TS) bf16

    acc = jnp.zeros((Cmid, TS), jnp.float32)
    for kh in range(KH):
        for kw in range(KW):
            # tap[ci, p] = x[ci, h+kh-1, w+kw-1] for output pixel p = h*W + w
            off = (W + 1) + (kh - 1) * W + (kw - 1)          # static offset
            tap = xw[:, pl.ds(off, TS)]                       # (Cin, TS) bf16
            if kw == 0:                                       # w-1 invalid at w==0
                tap = tap * mask[0:1, :]
            elif kw == 2:                                     # w+1 invalid at w==W-1
                tap = tap * mask[1:2, :]
            acc = acc + jnp.dot(w_ref[kh * KW + kw], tap,
                                preferred_element_type=jnp.float32)

    s1 = bn_ref[:, 0:1]
    b1 = bn_ref[:, 1:2]
    s2 = bn_ref[:, 2:3]
    b2 = bn_ref[:, 3:4]
    y = jnp.maximum(acc * s1 + b1, 0.0)       # BN1 + ReLU
    y = jnp.maximum(y * s2 + b2, 0.0)         # BN2 (commuted past shuffle) + ReLU
    o_ref[0] = y.astype(o_ref.dtype)


def _pick_tile(HW, Cin, Cmid, N):
    """Spatial tile size (lanes): VMEM-budget and generation aware."""
    # bytes of VMEM per output lane: double-buffered bf16 in/out, f32
    # accumulator, a live tap, masks (weights/BN are negligible).
    per_lane = 8 * Cin + 8 * Cmid + 16
    budget = 8 * 1024 * 1024                  # conservative default (v5e-safe)
    try:
        cap = getattr(pltpu.get_tpu_info(), "vmem_capacity_bytes", 0) or 0
        if cap:
            budget = max(budget, min(cap // 6, 24 * 1024 * 1024))
    except Exception:
        pass
    max_ts = max(128, (budget // per_lane) // 128 * 128)

    hwp0 = pl.cdiv(HW, 128) * 128             # lane-dense target
    ts = min(max_ts, hwp0)
    nt = pl.cdiv(hwp0, ts)
    # v7x has two TensorCores: make sure the parallel grid has >= 2 steps.
    if N * nt < 2 and hwp0 >= 256:
        nt = 2
    ts = pl.cdiv(pl.cdiv(hwp0, nt), 128) * 128
    hwp = nt * ts
    return ts, hwp, nt


def decoder_block_forward(x_nchw, params):
    N, Cin, H, Wd = x_nchw.shape
    w = params["conv_w"]                      # (3, 3, Cin, Cmid) HWIO
    Cmid = w.shape[-1]
    r = UPSCALE
    Cout = Cmid // (r * r)
    HW = H * Wd

    # ---- BatchNorm (inference) folded to per-channel scale/bias, kept in f32
    #      and applied post-matmul (idle VPU), so extreme BN stats are safe.
    s1 = params["bn1_gamma"] * lax.rsqrt(params["bn1_var"] + EPS)
    b1 = params["bn1_beta"] - params["bn1_mean"] * s1
    s2o = params["bn2_gamma"] * lax.rsqrt(params["bn2_var"] + EPS)
    b2o = params["bn2_beta"] - params["bn2_mean"] * s2o
    # BN2 + ReLU commute with PixelShuffle once expanded to mid channels.
    s2 = jnp.repeat(s2o, r * r)
    b2 = jnp.repeat(b2o, r * r)
    bn = jnp.stack([s1, b1, s2, b2], axis=1).astype(jnp.float32)   # (Cmid, 4)

    # Weights tap-major: wt[kh*3+kw, cm, ci] = w[kh, kw, ci, cm]
    wt = jnp.transpose(w, (0, 1, 3, 2)).reshape(KH * KW, Cmid, Cin)
    wt = wt.astype(jnp.bfloat16)

    # ---- tile selection (VMEM / generation aware)
    TS, HWp, nt = _pick_tile(HW, Cin, Cmid, N)
    TSH = TS + 2 * (Wd + 1)

    # ---- single cheap wrapper pass: bf16 cast + flat zero pad (no im2col).
    # xfp[n, ci, (W+1) + h*W + w] = x[n, ci, h, w]; zeros elsewhere.
    xflat = x_nchw.astype(jnp.bfloat16).reshape(N, Cin, HW)
    xfp = jnp.pad(xflat, ((0, 0), (0, 0), (Wd + 1, (HWp - HW) + Wd + 1)))
    # per-tile halo'd windows (only 2W+2 lanes of duplication per tile)
    xtiles = jnp.stack([xfp[:, :, t * TS: t * TS + TSH] for t in range(nt)],
                       axis=1)                                  # (N, nt, Cin, TSH)

    # column-validity masks for the kw=0 / kw=2 taps (horizontal edges)
    col = jnp.arange(HWp, dtype=jnp.int32) % Wd
    mask = jnp.stack([col != 0, col != Wd - 1]).astype(jnp.bfloat16)  # (2, HWp)

    grid = (N, nt)

    # rough per-step VMEM bytes (double-buffered IO + f32 accumulator + taps)
    vmem_need = (2 * Cin * TSH * 2 + 2 * Cmid * TS * 2 + 2 * 2 * TS * 2 +
                 Cmid * TS * 4 + 2 * Cin * TS * 2 +
                 2 * KH * KW * Cmid * Cin * 2 + 2 * Cmid * 4 * 4)
    vmem_limit = int(min(48 * 1024 * 1024,
                         max(16 * 1024 * 1024, 3 * vmem_need)))

    y = pl.pallas_call(
        functools.partial(_decoder_block_kernel, W=Wd),
        out_shape=jax.ShapeDtypeStruct((N, Cmid, HWp), jnp.bfloat16),
        grid=grid,
        in_specs=[
            pl.BlockSpec((1, 1, Cin, TSH), lambda n, t: (n, t, 0, 0)),
            pl.BlockSpec((2, TS), lambda n, t: (0, t)),
            pl.BlockSpec((KH * KW, Cmid, Cin), lambda n, t: (0, 0, 0)),
            pl.BlockSpec((Cmid, 4), lambda n, t: (0, 0)),
        ],
        out_specs=pl.BlockSpec((1, Cmid, TS), lambda n, t: (n, 0, t)),
        compiler_params=pltpu.CompilerParams(
            dimension_semantics=("parallel", "parallel"),
            vmem_limit_bytes=vmem_limit),
    )(xtiles, mask, wt, bn)

    # ---- PixelShuffle(2): kernel already emitted channel-major (NCHW) mid
    # activations with BN2/ReLU applied, so this is one bf16-read / f32-write
    # pass (spatial pad is stripped here and fuses into the same pass).
    y = y[:, :, :HW].reshape(N, Cout, r, r, H, Wd)
    z = jnp.transpose(y, (0, 1, 4, 2, 5, 3)).reshape(N, Cout, H * r, Wd * r)
    return z.astype(jnp.float32)


def reference_forward(x_nchw, params, match_kernel_precision=False):
    """Pure-JAX reference mirroring the PyTorch module (eval-mode BN).

    match_kernel_precision=True feeds the conv the same bf16-rounded operands
    the kernel uses (f32 accumulation), so the comparison stays tight.
    """
    w_hwio = params["conv_w"]
    x = x_nchw.astype(jnp.float32)
    if match_kernel_precision:
        w_hwio = w_hwio.astype(jnp.bfloat16).astype(jnp.float32)
        x = x.astype(jnp.bfloat16).astype(jnp.float32)

    w_oihw = jnp.transpose(w_hwio, (3, 2, 0, 1))
    y = lax.conv_general_dilated(
        x, w_oihw, window_strides=(1, 1), padding="SAME",
        dimension_numbers=("NCHW", "OIHW", "NCHW"))

    s1 = params["bn1_gamma"] * lax.rsqrt(params["bn1_var"] + EPS)
    b1 = params["bn1_beta"] - params["bn1_mean"] * s1
    y = y * s1[None, :, None, None] + b1[None, :, None, None]
    y = jnp.maximum(y, 0.0)

    N, C, H, W = y.shape
    r = UPSCALE
    Cout = C // (r * r)
    y = y.reshape(N, Cout, r, r, H, W)
    y = jnp.transpose(y, (0, 1, 4, 2, 5, 3)).reshape(N, Cout, H * r, W * r)

    s2 = params["bn2_gamma"] * lax.rsqrt(params["bn2_var"] + EPS)
    b2 = params["bn2_beta"] - params["bn2_mean"] * s2
    y = y * s2[None, :, None, None] + b2[None, :, None, None]
    return jnp.maximum(y, 0.0)


if __name__ == "__main__":
    # Small shapes consistent with the module: pixelshuffle needs mid = 4*out.
    N, Cin, H, W = 2, 4, 16, 16
    Cmid, Cout = 16, 4

    key = jax.random.PRNGKey(0)
    ks = jax.random.split(key, 10)
    params = {
        "conv_w":   0.1 * jax.random.normal(ks[0], (KH, KW, Cin, Cmid), jnp.float32),
        "bn1_gamma": 1.0 + 0.1 * jax.random.normal(ks[1], (Cmid,), jnp.float32),
        "bn1_beta":  0.1 * jax.random.normal(ks[2], (Cmid,), jnp.float32),
        "bn1_mean":  0.1 * jax.random.normal(ks[3], (Cmid,), jnp.float32),
        "bn1_var":   0.5 + jnp.abs(jax.random.normal(ks[4], (Cmid,), jnp.float32)),
        "bn2_gamma": 1.0 + 0.1 * jax.random.normal(ks[5], (Cout,), jnp.float32),
        "bn2_beta":  0.1 * jax.random.normal(ks[6], (Cout,), jnp.float32),
        "bn2_mean":  0.1 * jax.random.normal(ks[7], (Cout,), jnp.float32),
        "bn2_var":   0.5 + jnp.abs(jax.random.normal(ks[8], (Cout,), jnp.float32)),
    }
    x = jax.random.normal(ks[9], (N, Cin, H, W), jnp.float32)

    out = jax.block_until_ready(decoder_block_forward(x, params))
    assert out.shape == (N, Cout, H * UPSCALE, W * UPSCALE), out.shape
    assert out.dtype == jnp.float32, out.dtype

    # Tight-ish check: reference fed the same bf16-rounded conv operands
    # (f32 accumulation); slack covers the kernel's final bf16 store rounding.
    ref_bf16 = jax.block_until_ready(
        reference_forward(x, params, match_kernel_precision=True))
    assert jnp.allclose(out, ref_bf16, atol=1e-2, rtol=1e-2), \
        float(jnp.max(jnp.abs(out - ref_bf16)))

    # Sanity check vs. exact f32 module semantics (slack covers bf16 rounding
    # of conv inputs/weights and of the stored activation).
    ref_f32 = jax.block_until_ready(reference_forward(x, params))
    assert jnp.allclose(out, ref_f32, atol=6e-2, rtol=6e-2), \
        float(jnp.max(jnp.abs(out - ref_f32)))

    print("KERNEL_OK")
</pallas_src>

<mosaic_0001>
module attributes {stable_mosaic.version = 11 : i64} {
  func.func @_decoder_block_kernel(%arg0: i32, %arg1: i32, %arg2: memref<1x1x4x290xbf16, #tpu.memory_space<vmem>>, %arg3: memref<2x256xbf16, #tpu.memory_space<vmem>>, %arg4: memref<9x16x4xbf16, #tpu.memory_space<vmem>>, %arg5: memref<16x4xf32, #tpu.memory_space<vmem>>, %arg6: memref<1x16x256xbf16, #tpu.memory_space<vmem>>) attributes {dimension_semantics = [#tpu.dimension_semantics<parallel>, #tpu.dimension_semantics<parallel>], iteration_bounds = array<i64: 2, 1>, scalar_prefetch = 0 : i64, scratch_operands = 0 : i64, tpu.core_type = #tpu.core_type<tc>, window_params = [{transform_indices = @transform_0, window_bounds = array<i64: 1, 1, 4, 290>}, {transform_indices = @transform_1, window_bounds = array<i64: 2, 256>}, {pipeline_mode = #tpu.pipeline_mode<synchronous>, transform_indices = @transform_2, window_bounds = array<i64: 9, 16, 4>}, {pipeline_mode = #tpu.pipeline_mode<synchronous>, transform_indices = @transform_3, window_bounds = array<i64: 16, 4>}, {transform_indices = @transform_4, window_bounds = array<i64: 1, 16, 256>}]} {
    %c0 = arith.constant 0 : index
    %c0_0 = arith.constant 0 : index
    %0 = vector.load %arg3[%c0, %c0_0] : memref<2x256xbf16, #tpu.memory_space<vmem>>, vector<2x256xbf16>
    %cst = arith.constant 0.000000e+00 : f32
    %1 = vector.broadcast %cst : f32 to vector<16x256xf32>
    %c0_i32 = arith.constant 0 : i32
    %c0_i32_1 = arith.constant 0 : i32
    %c0_i32_2 = arith.constant 0 : i32
    %c0_i32_3 = arith.constant 0 : i32
    %2 = tpu.memref_slice %arg2[%c0_i32, %c0_i32_1, %c0_i32_2, %c0_i32_3] : memref<1x1x4x290xbf16, #tpu.memory_space<vmem>> -> memref<1x1x4x290xbf16, #tpu.memory_space<vmem>>
    %3 = tpu.memref_squeeze %2 : memref<1x1x4x290xbf16, #tpu.memory_space<vmem>> -> memref<4x290xbf16, #tpu.memory_space<vmem>>
    %c0_4 = arith.constant 0 : index
    %c0_5 = arith.constant 0 : index
    %4 = vector.load %3[%c0_4, %c0_5] : memref<4x290xbf16, #tpu.memory_space<vmem>>, vector<4x256xbf16>
    %5 = vector.extract_strided_slice %0 {offsets = [0, 0], sizes = [1, 256], strides = [1, 1]} : vector<2x256xbf16> to vector<1x256xbf16>
    %6 = vector.broadcast %5 : vector<1x256xbf16> to vector<4x256xbf16>
    %7 = arith.mulf %4, %6 : vector<4x256xbf16>
    %c0_6 = arith.constant 0 : index
    %c0_7 = arith.constant 0 : index
    %c0_8 = arith.constant 0 : index
    %8 = vector.load %arg4[%c0_6, %c0_7, %c0_8] : memref<9x16x4xbf16, #tpu.memory_space<vmem>>, vector<1x16x4xbf16>
    %9 = vector.shape_cast %8 : vector<1x16x4xbf16> to vector<16x4xbf16>
    %cst_9 = arith.constant dense<0.000000e+00> : vector<16x256xf32>
    %10 = tpu.matmul %9, %7, %cst_9 {dimension_numbers = #tpu.dot_dimension_numbers<[1], [0], [0], [1], [0, 0, 1, 1], [], []>} : vector<16x4xbf16>, vector<4x256xbf16>, vector<16x256xf32> -> vector<16x256xf32>
    %11 = arith.addf %1, %10 : vector<16x256xf32>
    %c0_i32_10 = arith.constant 0 : i32
    %c0_i32_11 = arith.constant 0 : i32
    %c0_i32_12 = arith.constant 0 : i32
    %c0_i32_13 = arith.constant 0 : i32
    %12 = tpu.memref_slice %arg2[%c0_i32_10, %c0_i32_11, %c0_i32_12, %c0_i32_13] : memref<1x1x4x290xbf16, #tpu.memory_space<vmem>> -> memref<1x1x4x290xbf16, #tpu.memory_space<vmem>>
    %13 = tpu.memref_squeeze %12 : memref<1x1x4x290xbf16, #tpu.memory_space<vmem>> -> memref<4x290xbf16, #tpu.memory_space<vmem>>
    %c0_14 = arith.constant 0 : index
    %c1 = arith.constant 1 : index
    %14 = vector.load %13[%c0_14, %c1] : memref<4x290xbf16, #tpu.memory_space<vmem>>, vector<4x256xbf16>
    %c1_15 = arith.constant 1 : index
    %c0_16 = arith.constant 0 : index
    %c0_17 = arith.constant 0 : index
    %15 = vector.load %arg4[%c1_15, %c0_16, %c0_17] : memref<9x16x4xbf16, #tpu.memory_space<vmem>>, vector<1x16x4xbf16>
    %16 = vector.shape_cast %15 : vector<1x16x4xbf16> to vector<16x4xbf16>
    %cst_18 = arith.constant dense<0.000000e+00> : vector<16x256xf32>
    %17 = tpu.matmul %16, %14, %cst_18 {dimension_numbers = #tpu.dot_dimension_numbers<[1], [0], [0], [1], [0, 0, 1, 1], [], []>} : vector<16x4xbf16>, vector<4x256xbf16>, vector<16x256xf32> -> vector<16x256xf32>
    %18 = arith.addf %11, %17 : vector<16x256xf32>
    %c0_i32_19 = arith.constant 0 : i32
    %c0_i32_20 = arith.constant 0 : i32
    %c0_i32_21 = arith.constant 0 : i32
    %c0_i32_22 = arith.constant 0 : i32
    %19 = tpu.memref_slice %arg2[%c0_i32_19, %c0_i32_20, %c0_i32_21, %c0_i32_22] : memref<1x1x4x290xbf16, #tpu.memory_space<vmem>> -> memref<1x1x4x290xbf16, #tpu.memory_space<vmem>>
    %20 = tpu.memref_squeeze %19 : memref<1x1x4x290xbf16, #tpu.memory_space<vmem>> -> memref<4x290xbf16, #tpu.memory_space<vmem>>
    %c0_23 = arith.constant 0 : index
    %c2 = arith.constant 2 : index
    %21 = vector.load %20[%c0_23, %c2] : memref<4x290xbf16, #tpu.memory_space<vmem>>, vector<4x256xbf16>
    %22 = vector.extract_strided_slice %0 {offsets = [1, 0], sizes = [1, 256], strides = [1, 1]} : vector<2x256xbf16> to vector<1x256xbf16>
    %23 = vector.broadcast %22 : vector<1x256xbf16> to vector<4x256xbf16>
    %24 = arith.mulf %21, %23 : vector<4x256xbf16>
    %c2_24 = arith.constant 2 : index
    %c0_25 = arith.constant 0 : index
    %c0_26 = arith.constant 0 : index
    %25 = vector.load %arg4[%c2_24, %c0_25, %c0_26] : memref<9x16x4xbf16, #tpu.memory_space<vmem>>, vector<1x16x4xbf16>
    %26 = vector.shape_cast %25 : vector<1x16x4xbf16> to vector<16x4xbf16>
    %cst_27 = arith.constant dense<0.000000e+00> : vector<16x256xf32>
    %27 = tpu.matmul %26, %24, %cst_27 {dimension_numbers = #tpu.dot_dimension_numbers<[1], [0], [0], [1], [0, 0, 1, 1], [], []>} : vector<16x4xbf16>, vector<4x256xbf16>, vector<16x256xf32> -> vector<16x256xf32>
    %28 = arith.addf %18, %27 : vector<16x256xf32>
    %c0_i32_28 = arith.constant 0 : i32
    %c0_i32_29 = arith.constant 0 : i32
    %c0_i32_30 = arith.constant 0 : i32
    %c0_i32_31 = arith.constant 0 : i32
    %29 = tpu.memref_slice %arg2[%c0_i32_28, %c0_i32_29, %c0_i32_30, %c0_i32_31] : memref<1x1x4x290xbf16, #tpu.memory_space<vmem>> -> memref<1x1x4x290xbf16, #tpu.memory_space<vmem>>
    %30 = tpu.memref_squeeze %29 : memref<1x1x4x290xbf16, #tpu.memory_space<vmem>> -> memref<4x290xbf16, #tpu.memory_space<vmem>>
    %c0_32 = arith.constant 0 : index
    %c16 = arith.constant 16 : index
    %31 = vector.load %30[%c0_32, %c16] : memref<4x290xbf16, #tpu.memory_space<vmem>>, vector<4x256xbf16>
    %32 = vector.extract_strided_slice %0 {offsets = [0, 0], sizes = [1, 256], strides = [1, 1]} : vector<2x256xbf16> to vector<1x256xbf16>
    %33 = vector.broadcast %32 : vector<1x256xbf16> to vector<4x256xbf16>
    %34 = arith.mulf %31, %33 : vector<4x256xbf16>
    %c3 = arith.constant 3 : index
    %c0_33 = arith.constant 0 : index
    %c0_34 = arith.constant 0 : index
    %35 = vector.load %arg4[%c3, %c0_33, %c0_34] : memref<9x16x4xbf16, #tpu.memory_space<vmem>>, vector<1x16x4xbf16>
    %36 = vector.shape_cast %35 : vector<1x16x4xbf16> to vector<16x4xbf16>
    %cst_35 = arith.constant dense<0.000000e+00> : vector<16x256xf32>
    %37 = tpu.matmul %36, %34, %cst_35 {dimension_numbers = #tpu.dot_dimension_numbers<[1], [0], [0], [1], [0, 0, 1, 1], [], []>} : vector<16x4xbf16>, vector<4x256xbf16>, vector<16x256xf32> -> vector<16x256xf32>
    %38 = arith.addf %28, %37 : vector<16x256xf32>
    %c0_i32_36 = arith.constant 0 : i32
    %c0_i32_37 = arith.constant 0 : i32
    %c0_i32_38 = arith.constant 0 : i32
    %c0_i32_39 = arith.constant 0 : i32
    %39 = tpu.memref_slice %arg2[%c0_i32_36, %c0_i32_37, %c0_i32_38, %c0_i32_39] : memref<1x1x4x290xbf16, #tpu.memory_space<vmem>> -> memref<1x1x4x290xbf16, #tpu.memory_space<vmem>>
    %40 = tpu.memref_squeeze %39 : memref<1x1x4x290xbf16, #tpu.memory_space<vmem>> -> memref<4x290xbf16, #tpu.memory_space<vmem>>
    %c0_40 = arith.constant 0 : index
    %c17 = arith.constant 17 : index
    %41 = vector.load %40[%c0_40, %c17] : memref<4x290xbf16, #tpu.memory_space<vmem>>, vector<4x256xbf16>
    %c4 = arith.constant 4 : index
    %c0_41 = arith.constant 0 : index
    %c0_42 = arith.constant 0 : index
    %42 = vector.load %arg4[%c4, %c0_41, %c0_42] : memref<9x16x4xbf16, #tpu.memory_space<vmem>>, vector<1x16x4xbf16>
    %43 = vector.shape_cast %42 : vector<1x16x4xbf16> to vector<16x4xbf16>
    %cst_43 = arith.constant dense<0.000000e+00> : vector<16x256xf32>
    %44 = tpu.matmul %43, %41, %cst_43 {dimension_numbers = #tpu.dot_dimension_numbers<[1], [0], [0], [1], [0, 0, 1, 1], [], []>} : vector<16x4xbf16>, vector<4x256xbf16>, vector<16x256xf32> -> vector<16x256xf32>
    %45 = arith.addf %38, %44 : vector<16x256xf32>
    %c0_i32_44 = arith.constant 0 : i32
    %c0_i32_45 = arith.constant 0 : i32
    %c0_i32_46 = arith.constant 0 : i32
    %c0_i32_47 = arith.constant 0 : i32
    %46 = tpu.memref_slice %arg2[%c0_i32_44, %c0_i32_45, %c0_i32_46, %c0_i32_47] : memref<1x1x4x290xbf16, #tpu.memory_space<vmem>> -> memref<1x1x4x290xbf16, #tpu.memory_space<vmem>>
    %47 = tpu.memref_squeeze %46 : memref<1x1x4x290xbf16, #tpu.memory_space<vmem>> -> memref<4x290xbf16, #tpu.memory_space<vmem>>
    %c0_48 = arith.constant 0 : index
    %c18 = arith.constant 18 : index
    %48 = vector.load %47[%c0_48, %c18] : memref<4x290xbf16, #tpu.memory_space<vmem>>, vector<4x256xbf16>
    %49 = vector.extract_strided_slice %0 {offsets = [1, 0], sizes = [1, 256], strides = [1, 1]} : vector<2x256xbf16> to vector<1x256xbf16>
    %50 = vector.broadcast %49 : vector<1x256xbf16> to vector<4x256xbf16>
    %51 = arith.mulf %48, %50 : vector<4x256xbf16>
    %c5 = arith.constant 5 : index
    %c0_49 = arith.constant 0 : index
    %c0_50 = arith.constant 0 : index
    %52 = vector.load %arg4[%c5, %c0_49, %c0_50] : memref<9x16x4xbf16, #tpu.memory_space<vmem>>, vector<1x16x4xbf16>
    %53 = vector.shape_cast %52 : vector<1x16x4xbf16> to vector<16x4xbf16>
    %cst_51 = arith.constant dense<0.000000e+00> : vector<16x256xf32>
    %54 = tpu.matmul %53, %51, %cst_51 {dimension_numbers = #tpu.dot_dimension_numbers<[1], [0], [0], [1], [0, 0, 1, 1], [], []>} : vector<16x4xbf16>, vector<4x256xbf16>, vector<16x256xf32> -> vector<16x256xf32>
    %55 = arith.addf %45, %54 : vector<16x256xf32>
    %c0_i32_52 = arith.constant 0 : i32
    %c0_i32_53 = arith.constant 0 : i32
    %c0_i32_54 = arith.constant 0 : i32
    %c0_i32_55 = arith.constant 0 : i32
    %56 = tpu.memref_slice %arg2[%c0_i32_52, %c0_i32_53, %c0_i32_54, %c0_i32_55] : memref<1x1x4x290xbf16, #tpu.memory_space<vmem>> -> memref<1x1x4x290xbf16, #tpu.memory_space<vmem>>
    %57 = tpu.memref_squeeze %56 : memref<1x1x4x290xbf16, #tpu.memory_space<vmem>> -> memref<4x290xbf16, #tpu.memory_space<vmem>>
    %c0_56 = arith.constant 0 : index
    %c32 = arith.constant 32 : index
    %58 = vector.load %57[%c0_56, %c32] : memref<4x290xbf16, #tpu.memory_space<vmem>>, vector<4x256xbf16>
    %59 = vector.extract_strided_slice %0 {offsets = [0, 0], sizes = [1, 256], strides = [1, 1]} : vector<2x256xbf16> to vector<1x256xbf16>
    %60 = vector.broadcast %59 : vector<1x256xbf16> to vector<4x256xbf16>
    %61 = arith.mulf %58, %60 : vector<4x256xbf16>
    %c6 = arith.constant 6 : index
    %c0_57 = arith.constant 0 : index
    %c0_58 = arith.constant 0 : index
    %62 = vector.load %arg4[%c6, %c0_57, %c0_58] : memref<9x16x4xbf16, #tpu.memory_space<vmem>>, vector<1x16x4xbf16>
    %63 = vector.shape_cast %62 : vector<1x16x4xbf16> to vector<16x4xbf16>
    %cst_59 = arith.constant dense<0.000000e+00> : vector<16x256xf32>
    %64 = tpu.matmul %63, %61, %cst_59 {dimension_numbers = #tpu.dot_dimension_numbers<[1], [0], [0], [1], [0, 0, 1, 1], [], []>} : vector<16x4xbf16>, vector<4x256xbf16>, vector<16x256xf32> -> vector<16x256xf32>
    %65 = arith.addf %55, %64 : vector<16x256xf32>
    %c0_i32_60 = arith.constant 0 : i32
    %c0_i32_61 = arith.constant 0 : i32
    %c0_i32_62 = arith.constant 0 : i32
    %c0_i32_63 = arith.constant 0 : i32
    %66 = tpu.memref_slice %arg2[%c0_i32_60, %c0_i32_61, %c0_i32_62, %c0_i32_63] : memref<1x1x4x290xbf16, #tpu.memory_space<vmem>> -> memref<1x1x4x290xbf16, #tpu.memory_space<vmem>>
    %67 = tpu.memref_squeeze %66 : memref<1x1x4x290xbf16, #tpu.memory_space<vmem>> -> memref<4x290xbf16, #tpu.memory_space<vmem>>
    %c0_64 = arith.constant 0 : index
    %c33 = arith.constant 33 : index
    %68 = vector.load %67[%c0_64, %c33] : memref<4x290xbf16, #tpu.memory_space<vmem>>, vector<4x256xbf16>
    %c7 = arith.constant 7 : index
    %c0_65 = arith.constant 0 : index
    %c0_66 = arith.constant 0 : index
    %69 = vector.load %arg4[%c7, %c0_65, %c0_66] : memref<9x16x4xbf16, #tpu.memory_space<vmem>>, vector<1x16x4xbf16>
    %70 = vector.shape_cast %69 : vector<1x16x4xbf16> to vector<16x4xbf16>
    %cst_67 = arith.constant dense<0.000000e+00> : vector<16x256xf32>
    %71 = tpu.matmul %70, %68, %cst_67 {dimension_numbers = #tpu.dot_dimension_numbers<[1], [0], [0], [1], [0, 0, 1, 1], [], []>} : vector<16x4xbf16>, vector<4x256xbf16>, vector<16x256xf32> -> vector<16x256xf32>
    %72 = arith.addf %65, %71 : vector<16x256xf32>
    %c0_i32_68 = arith.constant 0 : i32
    %c0_i32_69 = arith.constant 0 : i32
    %c0_i32_70 = arith.constant 0 : i32
    %c0_i32_71 = arith.constant 0 : i32
    %73 = tpu.memref_slice %arg2[%c0_i32_68, %c0_i32_69, %c0_i32_70, %c0_i32_71] : memref<1x1x4x290xbf16, #tpu.memory_space<vmem>> -> memref<1x1x4x290xbf16, #tpu.memory_space<vmem>>
    %74 = tpu.memref_squeeze %73 : memref<1x1x4x290xbf16, #tpu.memory_space<vmem>> -> memref<4x290xbf16, #tpu.memory_space<vmem>>
    %c0_72 = arith.constant 0 : index
    %c34 = arith.constant 34 : index
    %75 = vector.load %74[%c0_72, %c34] : memref<4x290xbf16, #tpu.memory_space<vmem>>, vector<4x256xbf16>
    %76 = vector.extract_strided_slice %0 {offsets = [1, 0], sizes = [1, 256], strides = [1, 1]} : vector<2x256xbf16> to vector<1x256xbf16>
    %77 = vector.broadcast %76 : vector<1x256xbf16> to vector<4x256xbf16>
    %78 = arith.mulf %75, %77 : vector<4x256xbf16>
    %c8 = arith.constant 8 : index
    %c0_73 = arith.constant 0 : index
    %c0_74 = arith.constant 0 : index
    %79 = vector.load %arg4[%c8, %c0_73, %c0_74] : memref<9x16x4xbf16, #tpu.memory_space<vmem>>, vector<1x16x4xbf16>
    %80 = vector.shape_cast %79 : vector<1x16x4xbf16> to vector<16x4xbf16>
    %cst_75 = arith.constant dense<0.000000e+00> : vector<16x256xf32>
    %81 = tpu.matmul %80, %78, %cst_75 {dimension_numbers = #tpu.dot_dimension_numbers<[1], [0], [0], [1], [0, 0, 1, 1], [], []>} : vector<16x4xbf16>, vector<4x256xbf16>, vector<16x256xf32> -> vector<16x256xf32>
    %82 = arith.addf %72, %81 : vector<16x256xf32>
    %c0_76 = arith.constant 0 : index
    %c0_77 = arith.constant 0 : index
    %83 = vector.load %arg5[%c0_76, %c0_77] : memref<16x4xf32, #tpu.memory_space<vmem>>, vector<16x1xf32>
    %c0_78 = arith.constant 0 : index
    %c1_79 = arith.constant 1 : index
    %84 = vector.load %arg5[%c0_78, %c1_79] : memref<16x4xf32, #tpu.memory_space<vmem>>, vector<16x1xf32>
    %c0_80 = arith.constant 0 : index
    %c2_81 = arith.constant 2 : index
    %85 = vector.load %arg5[%c0_80, %c2_81] : memref<16x4xf32, #tpu.memory_space<vmem>>, vector<16x1xf32>
    %c0_82 = arith.constant 0 : index
    %c3_83 = arith.constant 3 : index
    %86 = vector.load %arg5[%c0_82, %c3_83] : memref<16x4xf32, #tpu.memory_space<vmem>>, vector<16x1xf32>
    %87 = vector.broadcast %83 : vector<16x1xf32> to vector<16x256xf32>
    %88 = arith.mulf %82, %87 : vector<16x256xf32>
    %89 = vector.broadcast %84 : vector<16x1xf32> to vector<16x256xf32>
    %90 = arith.addf %88, %89 : vector<16x256xf32>
    %cst_84 = arith.constant 0.000000e+00 : f32
    %91 = vector.broadcast %cst_84 : f32 to vector<16x256xf32>
    %92 = arith.maximumf %90, %91 : vector<16x256xf32>
    %93 = vector.broadcast %85 : vector<16x1xf32> to vector<16x256xf32>
    %94 = arith.mulf %92, %93 : vector<16x256xf32>
    %95 = vector.broadcast %86 : vector<16x1xf32> to vector<16x256xf32>
    %96 = arith.addf %94, %95 : vector<16x256xf32>
    %cst_85 = arith.constant 0.000000e+00 : f32
    %97 = vector.broadcast %cst_85 : f32 to vector<16x256xf32>
    %98 = arith.maximumf %96, %97 : vector<16x256xf32>
    %99 = arith.truncf %98 : vector<16x256xf32> to vector<16x256xbf16>
    %c0_86 = arith.constant 0 : index
    %c0_87 = arith.constant 0 : index
    %c0_88 = arith.constant 0 : index
    %100 = vector.load %arg6[%c0_86, %c0_87, %c0_88] : memref<1x16x256xbf16, #tpu.memory_space<vmem>>, vector<1x16x256xbf16>
    %101 = vector.shape_cast %100 : vector<1x16x256xbf16> to vector<16x256xbf16>
    %102 = vector.shape_cast %99 : vector<16x256xbf16> to vector<1x16x256xbf16>
    tpu.vector_store %arg6[%c0_86, %c0_87, %c0_88], %102 {strides = array<i32>} : memref<1x16x256xbf16, #tpu.memory_space<vmem>>, vector<1x16x256xbf16>,
    return
  }
  func.func @transform_0(%arg0: i32, %arg1: i32) -> (i32, i32, i32, i32) {
    %c0_i32 = arith.constant 0 : i32
    %c0_i32_0 = arith.constant 0 : i32
    %c0_i32_1 = arith.constant 0 : i32
    return %arg0, %arg1, %c0_i32, %c0_i32_0 : i32, i32, i32, i32
  }
  func.func @transform_1(%arg0: i32, %arg1: i32) -> (i32, i32) {
    %c0_i32 = arith.constant 0 : i32
    %c0_i32_0 = arith.constant 0 : i32
    return %c0_i32, %arg1 : i32, i32
  }
  func.func @transform_2(%arg0: i32, %arg1: i32) -> (i32, i32, i32) {
    %c0_i32 = arith.constant 0 : i32
    %c0_i32_0 = arith.constant 0 : i32
    %c0_i32_1 = arith.constant 0 : i32
    %c0_i32_2 = arith.constant 0 : i32
    return %c0_i32, %c0_i32_0, %c0_i32_1 : i32, i32, i32
  }
  func.func @transform_3(%arg0: i32, %arg1: i32) -> (i32, i32) {
    %c0_i32 = arith.constant 0 : i32
    %c0_i32_0 = arith.constant 0 : i32
    %c0_i32_1 = arith.constant 0 : i32
    return %c0_i32, %c0_i32_0 : i32, i32
  }
  func.func @transform_4(%arg0: i32, %arg1: i32) -> (i32, i32, i32) {
    %c0_i32 = arith.constant 0 : i32
    %c0_i32_0 = arith.constant 0 : i32
    return %arg0, %c0_i32, %arg1 : i32, i32, i32
  }
}

</mosaic_0001>

<bundles_post_ra>
// kernel: tpu_custom_call.1
= control target key start
LH: loop header
LB: loop body
LE: loop exit
PB: predicated region body
PF: predicated region fallthrough
CT: control target
= control target key end

     0   :  { %9 = vsyncpa [#allocation3], 0  ;;  %s1895_s0 = inlined_call_operand.vmem [shape: bf16[2,1,4,290], index: 0, kind: input, shape index: {}]   ;;  %s1896_s1 = inlined_call_operand.vmem [shape: bf16[2,256], index: 1, kind: input, shape index: {}]   ;;  %s1897_s2 = inlined_call_operand.vmem [shape: bf16[9,16,4], index: 2, kind: input, shape index: {}]   ;;  %s1898_s3 = inlined_call_operand.vmem [shape: f32[16,4], index: 3, kind: input, shape index: {}]   ;;  %s1899_s4 = inlined_call_operand.hbm [shape: bf16[2,16,256], index: 4, kind: output, shape index: {}]  }
   0x1   :  { %11 = vsyncpa [#allocation3 + $0x1], 0  ;;  %s1650_s15 = smov 0   ;;  %s1652_s16 = smov 0  }
   0x2   :  { %s1654_s17 = smov 0   ;;  %s1656_s18 = smov 0  }
   0x3   :  { %s1658_s19 = smov 0   ;;  %s1660_s20 = smov 0  }
   0x4 LB: > { %s1333_s21 = sadd.s32 4294967295, %s1601_s20   ;;  %s1334_s22 = sadd.s32 4294967294, %s1601_s20   ;;  %s1601_s20 = sphi %s1660_s20, %s17_s20   ;;  %s1597_s19 = sphi %s1658_s19, %s1906_s19   ;;  %s1593_s18 = sphi %s1656_s18, %s1905_s18   ;;  %s1589_s17 = sphi %s1654_s17, %s1904_s17   ;;  %s1585_s16 = sphi %s1652_s16, %s1903_s16   ;;  %s1581_s15 = sphi %s1650_s15, %s1902_s15  }
   0x5   : > { %s29_s23 = sadd.s32 1, %s1597_s19  ;;  %s134_s24 = sadd.s32 1, %s1589_s17 }
   0x6   : > { %p31_p0 = scmp.ge.s32.totalorder %s29_s23, 2  ;;  %p144_p1 = scmp.ne.s32.totalorder %s1589_s17, %s1585_s16 }
   0x7   : > { %p145_p2 = scmp.eq.s32.totalorder %s1333_s21, 1  ;;  %p150_p3 = scmp.ne.s32.totalorder %s1585_s16, %s1581_s15 }
   0x8   : > { %s1908_s23 = smov (%p31_p0, %s29_s23), 0  ;;  %p151_p5 = scmp.eq.s32.totalorder %s1334_s22, 1 }
   0x9   : > { %p1690_p4 = por %p145_p2, %p144_p1  ;;  %s129_s26 = ssub.s32 %s1597_s19, %s1908_s23 }
   0xa   : > { %p1338_p6 = scmp.ge.s32.totalorder %s1601_s20, 1  ;;  %p132_p7 = scmp.eq.s32.totalorder %s129_s26, 0 }
   0xb   : > { %p1697_p8 = por %p151_p5, %p150_p3  ;;  %p195_p9 = scmp.lt.s32.totalorder %s1601_s20, 3 }
   0xc   : > { %s1703_s28 = scalar_select %p132_p7, %s1589_s17, %s134_s24  }
   0xd   : > { %p196_p10 = pnand %p1338_p6, %p195_p9 }
   0xe   : > { %v1341_v0 = vld.sshfl [vmem:[%s1896_s1] sm:$0x11 pattern:$0x75316420] (!%p196_p10)  ;;  %v259_v1 = vlaneseq (!%p196_p10)  ;;  %v1603_v2 = vmov (!%p196_p10), 1966171168  }
   0xf   : > { %199 = sbr.rel (%p196_p10) target bundleno = 561 (0x231), region = 36  ;;  %v257_v3 = vunpack.c.l.s4 (!%p196_p10), %v1603_v2  ;;  %p229_p11 = scmp.lt.s32.totalorder (!%p196_p10), %s1593_s18, 1  ;;  %v255_v5 = vcombine.high (!%p196_p10), %v1341_v0, %v1341_v0  ;;  %v1604_v7 = vmov (!%p196_p10), 1983009808   ;;  %v1612_v41 = vmov (!%p196_p10), 0  }
  0x10   : > { %v260_v4 = vshrl.u32 (!%p196_p10), %v259_v1, 7  ;;  %v288_v8 = vunpack.c.l.s4 (!%p196_p10), %v1604_v7  ;;  %s1605_s10 = smov (!%p196_p10), 18   ;;  %s1606_s11 = smov (!%p196_p10), 2   ;;  %749 = vmatprep.mubr.bf16.mxu0 (!%p196_p10), %v1612_v41  ;;  %376 = vmatprep.mubr.bf16.mxu1 (!%p196_p10), %v1612_v41  ;;  %vm768_vm0 = vcmask (!%p196_p10), 146432   ;;  %vm866_vm1 = vcmask (!%p196_p10), 261120  }
  0x11   : > { %v258_v6 = vunpack.c.0.s8 (!%p196_p10), %v257_v3  ;;  %s1607_s12 = smov (!%p196_p10), 32   ;;  %s1608_s13 = smov (!%p196_p10), 16   ;;  %1504 = vset.pattern.permute.xlu1 (!%p196_p10), %v1612_v41  ;;  %1505 = vset.pattern.permute.xlu0 (!%p196_p10), %v1612_v41  ;;  %vm481_vm2 = vcmask (!%p196_p10), 15360   ;;  %vm705_vm3 = vcmask (!%p196_p10), 908288   ;;  %vm337_vm4 = vcmask (!%p196_p10), 1041408  }
  0x12   : > { %v275_v10 = vsub.s32 (!%p196_p10), 0, %v260_v4  ;;  %v289_v13 = vunpack.c.0.s8 (!%p196_p10), %v288_v8  ;;  %s1609_s14 = smov (!%p196_p10), 34   ;;  %s1610_s21 = smov (!%p196_p10), 111   ;;  %vm330_vm5 = vcmask (!%p196_p10), 1039360   ;;  %vm333_vm6 = vcmask (!%p196_p10), 31744  }
  0x13   : > { %v261_v9 = vsub.s32 (!%p196_p10), %v258_v6, %v260_v4  ;;  %s1611_s22 = smov (!%p196_p10), 127   ;;  %s1613_s24 = smov (!%p196_p10), 110   ;;  %vm579_vm7 = vcmask (!%p196_p10), 130048   ;;  %vm1055_vm8 = vcmask (!%p196_p10), 277504   ;;  %vm803_vm9 = vcmask (!%p196_p10), 900096  }
  0x14   : > { %v1710_v22 = vsub.s32 (!%p196_p10), %v289_v13, %v260_v4  ;;  %s1614_s26 = smov (!%p196_p10), 96   ;;  %vm901_vm10 = vcmask (!%p196_p10), 785408   ;;  %vm992_vm11 = vcmask (!%p196_p10), 777216   ;;  %vm516_vm12 = vcmask (!%p196_p10), 1031168  }
  0x15   : > { %v262_v11 = vrot.slane (!%p196_p10), %v1341_v0, %v261_v9  ;;  %v269_v12 = vrot.slane (!%p196_p10), %v255_v5, %v261_v9  ;;  %vm614_vm13 = vcmask (!%p196_p10), 916480   ;;  %vm1090_vm14 = vcmask (!%p196_p10), 769024  }
  0x16   : > { %s230_s5 = scalar_select %p229_p11, %s1593_s18, 1 }
  0x17   : > { %v454_v14 = vshrl.u32 %v262_v11, 16  ;;  %v461_v15 = vshrl.u32 %v269_v12, 16  ;;  %v271_v16 = vpack.i.b16 %v262_v11, %v262_v11  ;;  %v278_v17 = vpack.i.b16 %v269_v12, %v269_v12 }
  0x18   : > { %s1427_s6 = smul.u32 6, %s230_s5  ;;  %s1615_s5 = smov 126  }
  0x19   : > { %v455_v18 = vpack.i.b16 %v454_v14, %v454_v14  ;;  %v462_v19 = vpack.i.b16 %v461_v15, %v461_v15  ;;  %v276_v20 = vrot.slane %v271_v16, %v275_v10  ;;  %v283_v21 = vrot.slane %v278_v17, %v275_v10 }
  0x1a   : > { %s1715_s9 = scalar_lea.vmem %s1895_s0, %s1427_s6  ;;  %s1616_s6 = smov 95  }
  0x1b   : > { %v460_v23 = vrot.slane %v455_v18, %v275_v10  ;;  %v467_v24 = vrot.slane %v462_v19, %v275_v10  ;;  %v286_v25 = vcombine.low %v276_v20, %v283_v21  ;;  %v1718_v26 = vld [vmem:[%s1715_s9] sm:$0xf] }
  0x1c   : > { %v673_v31 = vld [vmem:[%s1715_s9] sm:$0x3f] }
  0x1d   : > { %v470_v27 = vcombine.low %v460_v23, %v467_v24  ;;  %v1721_v28 = vrot.slane %v286_v25, %v1710_v22  ;;  %v690_v32 = vrot.slane %v673_v31, %v1710_v22  ;;  %v683_v33 = vcombine.high %v673_v31, %v673_v31  ;;  %v298_v34 = vld [vmem:[%s1715_s9] sm:$0x3f] }
  0x1e   : > { %v315_v37 = vrot.slane %v298_v34, %v1710_v22  ;;  %v308_v39 = vcombine.high %v298_v34, %v298_v34  ;;  %v764_v44 = vld [vmem:[%s1715_s9] sm:$0x3f] }
  0x1f   : > { %v477_v29 = vrot.slane %v470_v27, %v1710_v22  ;;  %v295_v30 = vmul.bf16 %v1721_v28, %v1718_v26  ;;  %v698_v35 = vcombine.high %v690_v32, %v690_v32  ;;  %v697_v36 = vrot.slane %v683_v33, %v1710_v22  ;;  %v862_v50 = vld [vmem:[%s1715_s9] sm:$0x3f] }
  0x20   : > { %v323_v38 = vcombine.high %v315_v37, %v315_v37  ;;  %v322_v40 = vrot.slane %v308_v39, %v1710_v22  ;;  %v453_v60 = vld [vmem:[%s1715_s9] sm:$0x3f] }
  0x21   : > { %765 = vrot.lane.b32.xlu0 %v477_v29, %s1605_s10  ;;  %478 = vrot.lane.b32.xlu1 %v477_v29, %s1606_s11  ;;  %v960_v5 = vld [vmem:[%s1715_s9] sm:$0x3f]  ;;  %v399_v16 = vrot.slane %v295_v30, %v1710_v22  ;;  %v1515_v30 = vld [vmem:[%s1897_s2 + $0x8] sm:$0xff]   ;;  %s1617_s10 = smov 112  }
  0x22   : > { %v1514_v10 = vld [vmem:[%s1897_s2 + $0x20] sm:$0xff]   ;;  %v977_v13 = vrot.slane %v960_v5, %v1710_v22  ;;  %v970_v18 = vcombine.high %v960_v5, %v960_v5 }
  0x23   : > { %v575_v19 = vld [vmem:[%s1715_s9] sm:$0x3f]  ;;  %v400_v26 = vcombine.high %v399_v16, %v399_v16  ;;  %v405_v33 = vsel %vm337_vm4, %v399_v16, 0 }
  0x24   : > { %v985_v23 = vcombine.high %v977_v13, %v977_v13 }
  0x25   : > { %863 = vrot.lane.b32.xlu0 %v1721_v28, %s1607_s12  ;;  %576 = vrot.lane.b32.xlu1 %v1721_v28, %s1608_s13  ;;  %s1618_s12 = smov 94   ;;  %s226_s13 = sand.u32 1, %s1585_s16  }
  0x29   : > { %1052 = vrot.lane.b32.xlu0 %v477_v29, %s1609_s14  ;;  %699 = vrot.lane.b32.xlu1 %v690_v32, %s1610_s21  ;;  %v984_v29 = vrot.slane %v970_v18, %v1710_v22  ;;  %s1339_s14 = sshll.u32 %s226_s13, 4 }
  0x2d   : > { %701 = vrot.lane.b32.xlu0 %v698_v35, %s1610_s21  ;;  %703 = vrot.lane.b32.xlu1 %v697_v36, %s1610_s21  ;;  %v1051_v35 = vld [vmem:[%s1715_s9] sm:$0x3f]  ;;  %s228_s21 = scalar_lea.vmem [#allocation2], %s1339_s14 }
  0x31   : > { %324 = vrot.lane.b32.xlu0 %v315_v37, %s1611_s22  ;;  %326 = vrot.lane.b32.xlu1 %v323_v38, %s1611_s22 }
  0x35   : > { %328 = vrot.lane.b32.xlu0 %v322_v40, %s1611_s22  ;;  %s1239_s22 = sshll.u32 %s228_s21, 4  ;;  %s1840_s22 = int_to_ptr.vmem [resolvable:$true] %s1239_s22 }
  0x93   : > { %v766_v42 = vpop.permute.xlu0 %765  ;;  %v479_v43 = vpop.permute.xlu1 %478 }
  0x94   : > { %v767_v45 = vrot.slane %v766_v42, 6  ;;  %v480_v52 = vrot.slane %v479_v43, 6 }
  0x96   : > { %v769_v46 = vsel %vm768_vm0, %v767_v45, %v766_v42  ;;  %v482_v61 = vsel %vm481_vm2, %v480_v52, %v479_v43  ;;  %v1517_v45 = vld [vmem:[%s1897_s2] sm:$0xff]  }
  0x97   : > { %v771_v47 = vmul.bf16 %v769_v46, %v764_v44  ;;  %v864_v48 = vpop.permute.xlu0 %863  ;;  %v577_v49 = vpop.permute.xlu1 %576  ;;  %v484_v1 = vmul.bf16 %v482_v61, %v453_v60 }
  0x98   : > { %v865_v51 = vrot.slane %v864_v48, 6  ;;  %v578_v11 = vrot.slane %v577_v49, 6 }
  0x99   : > { %v781_v53 = vcombine.high %v771_v47, %v771_v47  ;;  %v788_v54 = vrot.slane %v771_v47, %v1710_v22  ;;  %v501_v12 = vrot.slane %v484_v1, %v1710_v22  ;;  %v494_v21 = vcombine.high %v484_v1, %v484_v1 }
  0x9a   : > { %v867_v55 = vsel %vm866_vm1, %v865_v51, %v864_v48  ;;  %v580_v20 = vsel %vm579_vm7, %v578_v11, %v577_v49  ;;  %v1149_v48 = vld [vmem:[%s1898_s3] sm:$0xff]  ;;  %v1150_v49 = vld [vmem:[%s1898_s3 + $0x8] sm:$0xff]  ;;  %v1621_v51 = vmov 3  }
  0x9b   : > { %v869_v56 = vmul.bf16 %v867_v55, %v862_v50  ;;  %797 = vrot.lane.b32.xlu1 %v788_v54, %s1613_s24  ;;  %v796_v57 = vcombine.high %v788_v54, %v788_v54  ;;  %v1741_v58 = vpop.permute.xlu0 %1052  ;;  %v700_v59 = vpop.permute.xlu1 %699  ;;  %v795_v63 = vrot.slane %v781_v53, %v1710_v22  ;;  %v582_v28 = vmul.bf16 %v580_v20, %v575_v19 }
  0x9c   : > { %v1054_v31 = vrot.slane %v1741_v58, 6  ;;  %v508_v32 = vrot.slane %v494_v21, %v1710_v22  ;;  %v509_v38 = vcombine.high %v501_v12, %v501_v12  ;;  %v1619_v50 = vmov 1  }
  0x9d   : > { %v879_v62 = vcombine.high %v869_v56, %v869_v56  ;;  %799 = vrot.lane.b32.xlu0 %v796_v57, %s1613_s24  ;;  %v886_v0 = vrot.slane %v869_v56, %v1710_v22  ;;  %v599_v34 = vrot.slane %v582_v28, %v1710_v22  ;;  %v592_v37 = vcombine.high %v582_v28, %v582_v28 }
  0x9e   : > { %v1056_v36 = vsel %vm1055_vm8, %v1054_v31, %v1741_v58 }
  0x9f   : > { %801 = vrot.lane.b32.xlu1 %v795_v63, %s1613_s24  ;;  %v894_v2 = vcombine.high %v886_v0, %v886_v0  ;;  %v702_v3 = vpop.permute.xlu0 %701  ;;  %v704_v4 = vpop.permute.xlu1 %703  ;;  %v893_v8 = vrot.slane %v879_v62, %v1710_v22  ;;  %v1058_v39 = vmul.bf16 %v1056_v36, %v1051_v35  ;;  %v607_v40 = vcombine.high %v599_v34, %v599_v34  ;;  %s1394_s24 = sshll.u32 %s1593_s18, 8  ;;  %s1523_s18 = scalar_lea.vmem %s1840_s22, 256 }
  0xa0   : > { %v707_v6 = vsel %vm705_vm3, %v702_v3, %v704_v4  ;;  %v706_v7 = vsel %vm705_vm3, %v700_v59, %v702_v3  ;;  %v606_v42 = vrot.slane %v592_v37, %v1710_v22  ;;  %v1516_v59 = vld [vmem:[%s1897_s2 + $0x28] sm:$0xff]   ;;  %s1845_s30 = scalar_lea.hbm %s1899_s4, %s1394_s24  ;;  %p1524_p12 = scmp.ne.s32.totalorder %s1840_s22, %s1523_s18 }
  0xa1   : > { %895 = vrot.lane.b32.xlu0 %v886_v0, %s1614_s26  ;;  %1363 = vmatprep.subr.msk.bf16.mxu0 %vm337_vm4, %v707_v6  ;;  %v712_v9 = vsel %vm337_vm4, %v706_v7, 0  ;;  %v1068_v43 = vcombine.high %v1058_v39, %v1058_v39  ;;  %v1075_v44 = vrot.slane %v1058_v39, %v1710_v22  ;;  %v1518_v6 = vld [vmem:[%s1897_s2 + $0x30] sm:$0xff]  }
  0xa2   : > { %718 = vmatpush1.bf16.msra.mxu0 %v712_v9  ;;  %p1525_p13 = pnand %p1524_p12, %p1690_p4 }
  0xa3   : > { %897 = vrot.lane.b32.xlu1 %v894_v2, %s1614_s26  ;;  %v325_v14 = vpop.permute.xlu0 %324  ;;  %v327_v15 = vpop.permute.xlu1 %326  ;;  %v1083_v46 = vcombine.high %v1075_v44, %v1075_v44  ;;  %v1082_v47 = vrot.slane %v1068_v43, %v1710_v22  ;;  %v1620_v22 = vmov 2  }
  0xa4   : > { %v331_v17 = vsel %vm330_vm5, %v325_v14, %v327_v15  ;;  %p1526_p0 = pneg %p1525_p13 }
  0xa5   : > { %899 = vrot.lane.b32.xlu0 %v893_v8, %s1614_s26  ;;  %1364 = vmatmul.mubr.msk.bf16.vlgmr.msra.gmra.mrb[0].mxu0 %vm333_vm6, %v1514_v10  ;;  %v339_v25 = vsel %vm337_vm4, %v331_v17, 0 }
  0xa6   : > { %847 = vmatprep.mubr.bf16.mxu0 %v1612_v41 }
  0xa7   : > { %510 = vrot.lane.b32.xlu1 %v501_v12, %s1615_s5  ;;  %v329_v24 = vpop.permute.xlu0 %328 }
  0xa8   : > { %v332_v27 = vsel %vm330_vm5, %v327_v15, %v329_v24  ;;  %v1519_v15 = vld [vmem:[%s1897_s2 + $0x10] sm:$0xff]  }
  0xa9   : > { %986 = vrot.lane.b32.xlu0 %v977_v13, %s1616_s6  ;;  %1345 = vmatprep.subr.msk.bf16.mxu1 %vm337_vm4, %v332_v27 }
  0xaa   : > { %345 = vmatpush1.bf16.msra.mxu1 %v339_v25 }
  0xab   : > { %988 = vrot.lane.b32.xlu1 %v985_v23, %s1616_s6  ;;  %1348 = vmatprep.subr.msk.bf16.mxu1 %vm337_vm4, %v400_v26  ;;  %v1520_v23 = vld [vmem:[%s1897_s2 + $0x38] sm:$0xff]  }
  0xad   : > { %990 = vrot.lane.b32.xlu0 %v984_v29, %s1616_s6  ;;  %1346 = vmatmul.mubr.msk.bf16.vlgmr.msra.gmra.mrb[0].mxu1 %vm333_vm6, %v1515_v30  ;;  %v1521_v29 = vld [vmem:[%s1897_s2 + $0x18] sm:$0xff]   ;;  %v1522_v30 = vld [vmem:[%s1897_s2 + $0x40] sm:$0xff]   ;;  %s1622_s6 = smov [#allocation2]  }
  0xae   : > { %411 = vmatpush1.bf16.msra.mxu1 %v405_v33  ;;  %442 = vmatprep.mubr.bf16.mxu1 %v1612_v41  ;;  %s1527_s7 = sshll.u32 %s1622_s6, 4  ;;  %s1528_s7 = int_to_ptr.vmem [resolvable:$false] %s1527_s7 }
  0xaf   : > { %514 = vrot.lane.b32.xlu1 %v508_v32, %s1615_s5  ;;  %s1529_s8 = scalar_lea.vmem %s1528_s7, 512  ;;  %p1530_p1 = scmp.lt.s32.totalorder %s1840_s22, %s1528_s7 }
  0xb0   : > { %p1531_p2 = scmp.lt.s32.totalorder %s1529_s8, %s1523_s18 }
  0xb1   : > { %512 = vrot.lane.b32.xlu0 %v509_v38, %s1615_s5  ;;  %s1849_s5 = scalar_lea.sflag [#allocation3], %s226_s13 }
  0xb2   : > { %p1532_p3 = por %p1531_p2, %p1530_p1 }
  0xb3   : > { %608 = vrot.lane.b32.xlu1 %v599_v34, %s1617_s10 }
  0xb4   : > { %p1533_p5 = pnand %p1532_p3, %p1526_p0 }
  0xb5   : > { %610 = vrot.lane.b32.xlu0 %v607_v40, %s1617_s10 }
  0xb7   : > { %612 = vrot.lane.b32.xlu1 %v606_v42, %s1617_s10 }
  0xb9   : > { %1084 = vrot.lane.b32.xlu0 %v1075_v44, %s1618_s12  ;;  %1349 = vmatmul.mubr.msk.bf16.vlgmr.msra.gmra.mrb[0].mxu1 %vm333_vm6, %v1517_v45 }
  0xba   : > { %560 = vmatprep.mubr.bf16.mxu1 %v1612_v41 }
  0xbb   : > { %1086 = vrot.lane.b32.xlu1 %v1083_v46, %s1618_s12 }
  0xbd   : > { %1088 = vrot.lane.b32.xlu0 %v1082_v47, %s1618_s12 }
  0xbf   : > { %1153 = vperm.xlu1 %1504, %v1149_v48  }
  0xc1   : > { %1158 = vperm.xlu0 %1505, %v1150_v49  }
  0xc3   : > { %1506 = vset.pattern.permute.xlu1 %v1619_v50 }
  0xc4   : > { %1166 = vperm.xlu1 %1506, %v1149_v48  }
  0xc5   : > { %1507 = vset.pattern.permute.xlu0 %v1620_v22 }
  0xc6   : > { %1182 = vperm.xlu0 %1507, %v1149_v48  }
  0xc8   : > { %1170 = vperm.xlu1 %1506, %v1150_v49  }
  0xca   : > { %1510 = vset.pattern.permute.xlu0 %v1621_v51 }
  0xcb   : > { %1198 = vperm.xlu0 %1510, %v1150_v49  }
  0xcc   : > { %1508 = vset.pattern.permute.xlu1 %v1620_v22 }
  0xcd   : > { %1186 = vperm.xlu1 %1508, %v1150_v49  }
  0xd1   : > { %1509 = vset.pattern.permute.xlu1 %v1621_v51 }
  0xd2   : > { %1194 = vperm.xlu1 %1509, %v1149_v48  }
 0x10d   : > { %v798_v52 = vpop.permute.xlu1 %797 }
 0x10f   : > { %v800_v53 = vpop.permute.xlu0 %799 }
 0x110   : > { %v804_v54 = vsel %vm803_vm9, %v798_v52, %v800_v53 }
 0x111   : > { %v802_v55 = vpop.permute.xlu1 %801  ;;  %v810_v57 = vsel %vm337_vm4, %v804_v54, 0 }
 0x112   : > { %v805_v56 = vsel %vm803_vm9, %v800_v53, %v802_v55 }
 0x113   : > { %1368 = vmatprep.subr.msk.bf16.mxu0 %vm337_vm4, %v805_v56  ;;  %v896_v58 = vpop.permute.xlu0 %895 }
 0x114   : > { %816 = vmatpush1.bf16.msra.mxu0 %v810_v57 }
 0x115   : > { %v898_v60 = vpop.permute.xlu1 %897 }
 0x116   : > { %v902_v61 = vsel %vm901_vm10, %v896_v58, %v898_v60 }
 0x117   : > { %v908_v62 = vsel %vm337_vm4, %v902_v61, 0  ;;  %1369 = vmatmul.mubr.msk.bf16.vlgmr.msra.gmra.mrb[0].mxu0 %vm333_vm6, %v1516_v59  ;;  %v900_v63 = vpop.permute.xlu0 %899 }
 0x118   : > { %v903_v0 = vsel %vm901_vm10, %v898_v60, %v900_v63  ;;  %945 = vmatprep.mubr.bf16.mxu0 %v1612_v41 }
 0x119   : > { %v511_v1 = vpop.permute.xlu1 %510  ;;  %1373 = vmatprep.subr.msk.bf16.mxu0 %vm337_vm4, %v903_v0 }
 0x11a   : > { %914 = vmatpush1.bf16.msra.mxu0 %v908_v62 }
 0x11b   : > { %v987_v2 = vpop.permute.xlu0 %986 }
 0x11d   : > { %v989_v3 = vpop.permute.xlu1 %988 }
 0x11e   : > { %v993_v4 = vsel %vm992_vm11, %v987_v2, %v989_v3 }
 0x11f   : > { %v991_v5 = vpop.permute.xlu0 %990  ;;  %v999_v8 = vsel %vm337_vm4, %v993_v4, 0 }
 0x120   : > { %v994_v7 = vsel %vm992_vm11, %v989_v3, %v991_v5 }
 0x121   : > { %v515_v9 = vpop.permute.xlu1 %514  ;;  %1378 = vmatprep.subr.msk.bf16.mxu0 %vm337_vm4, %v994_v7 }
 0x123   : > { %1374 = vmatmul.mubr.msk.bf16.vlgmr.msra.gmra.mrb[0].mxu0 %vm333_vm6, %v1518_v6  ;;  %v513_v10 = vpop.permute.xlu0 %512 }
 0x124   : > { %v517_v11 = vsel %vm516_vm12, %v511_v1, %v513_v10  ;;  %v518_v12 = vsel %vm516_vm12, %v513_v10, %v515_v9  ;;  %1005 = vmatpush1.bf16.msra.mxu0 %v999_v8  ;;  %1036 = vmatprep.mubr.bf16.mxu0 %v1612_v41 }
 0x125   : > { %v523_v13 = vsel %vm337_vm4, %v517_v11, 0  ;;  %v609_v14 = vpop.permute.xlu1 %608  ;;  %1353 = vmatprep.subr.msk.bf16.mxu1 %vm337_vm4, %v518_v12 }
 0x126   : > { %529 = vmatpush1.bf16.msra.mxu1 %v523_v13 }
 0x127   : > { %v611_v16 = vpop.permute.xlu0 %610 }
 0x128   : > { %v615_v17 = vsel %vm614_vm13, %v609_v14, %v611_v16 }
 0x129   : > { %v621_v18 = vsel %vm337_vm4, %v615_v17, 0  ;;  %v613_v19 = vpop.permute.xlu1 %612  ;;  %1354 = vmatmul.mubr.msk.bf16.vlgmr.msra.gmra.mrb[0].mxu1 %vm333_vm6, %v1519_v15 }
 0x12a   : > { %v616_v20 = vsel %vm614_vm13, %v611_v16, %v613_v19  ;;  %658 = vmatprep.mubr.bf16.mxu1 %v1612_v41 }
 0x12b   : > { %v1085_v21 = vpop.permute.xlu0 %1084  ;;  %1358 = vmatprep.subr.msk.bf16.mxu1 %vm337_vm4, %v616_v20 }
 0x12c   : > { %627 = vmatpush1.bf16.msra.mxu1 %v621_v18 }
 0x12d   : > { %v1087_v24 = vpop.permute.xlu1 %1086 }
 0x12e   : > { %v1091_v25 = vsel %vm1090_vm14, %v1085_v21, %v1087_v24 }
 0x12f   : > { %v1097_v26 = vsel %vm337_vm4, %v1091_v25, 0  ;;  %1379 = vmatmul.mubr.msk.bf16.vlgmr.msra.gmra.mrb[0].mxu0 %vm333_vm6, %v1520_v23  ;;  %v1089_v27 = vpop.permute.xlu0 %1088 }
 0x130   : > { %v1092_v28 = vsel %vm1090_vm14, %v1087_v24, %v1089_v27  ;;  %1134 = vmatprep.mubr.bf16.mxu0 %v1612_v41 }
 0x131   : > { %1383 = vmatprep.subr.msk.bf16.mxu0 %vm337_vm4, %v1092_v28 }
 0x132   : > { %1103 = vmatpush1.bf16.msra.mxu0 %v1097_v26 }
 0x135   : > { %1359 = vmatmul.mubr.msk.bf16.vlgmr.msra.gmra.mrb[0].mxu1 %vm333_vm6, %v1521_v29 }
 0x13b   : > { %1384 = vmatmul.mubr.msk.bf16.vlgmr.msra.gmra.mrb[0].mxu0 %vm333_vm6, %v1522_v30 }
 0x13e   : > { %v1154_v31 = vpop.permute.xlu1 %1153 }
 0x140   : > { %v1159_v37 = vpop.permute.xlu0 %1158 }
 0x143   : > { %v1167_v32 = vpop.permute.xlu1 %1166 }
 0x145   : > { %v1183_v50 = vpop.permute.xlu0 %1182 }
 0x147   : > { %v1171_v36 = vpop.permute.xlu1 %1170 }
 0x14a   : > { %v1199_v63 = vpop.permute.xlu0 %1198 }
 0x14c   : > { %v1187_v44 = vpop.permute.xlu1 %1186 }
 0x151   : > { %v1195_v58 = vpop.permute.xlu1 %1194 }
 0x208   : > { %v660_v33 = vpop.f32.mrb[0].mxu1 }
 0x209   : > { %v662_v34 = vpop.f32.mrb[1].mxu1 }
 0x20a   : > { %v664_v41 = vpop.f32.mrb[2].mxu1 }
 0x20b   : > { %v666_v35 = vpop.f32.mrb[3].mxu1 }
 0x20e   : > { %v1136_v38 = vpop.f32.mrb[0].mxu0 }
 0x20f   : > { %v1395_v39 = vadd.f32 %v1136_v38, %v660_v33  ;;  %v1138_v40 = vpop.f32.mrb[1].mxu0 }
 0x210   : > { %v1396_v42 = vadd.f32 %v1138_v40, %v662_v34  ;;  %v1140_v43 = vpop.f32.mrb[2].mxu0 }
 0x211   : > { %v1161_v45 = vmul.f32 %v1395_v39, %v1154_v31  ;;  %v1397_v46 = vadd.f32 %v1140_v43, %v664_v41  ;;  %v1142_v47 = vpop.f32.mrb[3].mxu0 }
 0x212   : > { %v1162_v48 = vmul.f32 %v1396_v42, %v1154_v31  ;;  %v1398_v49 = vadd.f32 %v1142_v47, %v666_v35 }
 0x213   : > { %v1163_v22 = vmul.f32 %v1397_v46, %v1159_v37  ;;  %v1173_v51 = vadd.f32 %v1167_v32, %v1161_v45 }
 0x214   : > { %v1164_v52 = vmul.f32 %v1398_v49, %v1159_v37  ;;  %v1174_v53 = vadd.f32 %v1167_v32, %v1162_v48 }
 0x215   : > { %v1175_v54 = vadd.f32 %v1171_v36, %v1163_v22  ;;  %v1177_v55 = vmax.f32 %v1173_v51, 0.0 }
 0x216   : > { %v1176_v56 = vadd.f32 %v1171_v36, %v1164_v52  ;;  %v1178_v57 = vmax.f32 %v1174_v53, 0.0 }
 0x217   : > { %v1179_v59 = vmax.f32 %v1175_v54, 0.0  ;;  %v1189_v60 = vmul.f32 %v1183_v50, %v1177_v55 }
 0x218   : > { %v1180_v61 = vmax.f32 %v1176_v56, 0.0  ;;  %v1190_v62 = vmul.f32 %v1183_v50, %v1178_v57 }
 0x219   : > { %v1191_v0 = vmul.f32 %v1187_v44, %v1179_v59  ;;  %v1201_v1 = vadd.f32 %v1195_v58, %v1189_v60 }
 0x21a   : > { %v1192_v2 = vmul.f32 %v1187_v44, %v1180_v61  ;;  %v1202_v3 = vadd.f32 %v1195_v58, %v1190_v62 }
 0x21b   : > { %v1205_v4 = vmax.f32 %v1201_v1, 0.0  ;;  %v1203_v5 = vadd.f32 %v1199_v63, %v1191_v0 }
 0x21c   : > { %v1206_v6 = vmax.f32 %v1202_v3, 0.0  ;;  %v1204_v7 = vadd.f32 %v1199_v63, %v1192_v2 }
 0x21d   : > { %v1207_v8 = vmax.f32 %v1203_v5, 0.0 }
 0x21e   : > { %v1392_v9 = vpack.c.bf16 %v1206_v6, %v1205_v4  ;;  %v1208_v10 = vmax.f32 %v1204_v7, 0.0 }
 0x220   : > { %1221 = vst [vmem:[%s228_s21] sm:$0xff] %v1392_v9  ;;  %v1393_v11 = vpack.c.bf16 %v1208_v10, %v1207_v8 }
 0x222   : > { %1222 = vst [vmem:[%s228_s21 + $0x8] sm:$0xff] %v1393_v11 }
 0x223   : > { %1536 = shalt.err (!%p1533_p5)
}
 0x224   : > { %s1537_s10 = scalar_lea.hbm %s1845_s30, 256  ;;  %s1541_s12 = scalar_lea.hbm %s1899_s4, 512 }
 0x225   : > { %p1538_p6 = scmp.ne.s32.totalorder %s1845_s30, %s1537_s10  ;;  %p1542_p10 = scmp.lt.u32.totalorder %s1845_s30, %s1899_s4 }
 0x226   : > { %p1543_p11 = scmp.lt.u32.totalorder %s1541_s12, %s1537_s10  ;;  %p1545_p13 = scmp.lt.u32.totalorder %s1537_s10, %s1845_s30 }
 0x227   : > { %p1539_p7 = pnand %p1538_p6, %p1690_p4 }
 0x228   : > { %p1544_p12 = por %p1543_p11, %p1542_p10 }
 0x229   : > { %p1540_p9 = pneg %p1539_p7 }
 0x22a   : > { %p1546_p0 = por %p1545_p13, %p1544_p12 }
 0x22c   : > { %p1547_p1 = pnand %p1546_p0, %p1540_p9 }
 0x22e   : > { %1550 = shalt.err (!%p1547_p1)
}
 0x22f   : > { %s1623_s21 = smov 128   ;;  %s1624_s24 = smov 8  }
 0x230   : > { %1428 = dma.vmem_to_hbm [thread:$0]  (%p1690_p4), %s1840_s22, 256, %s1845_s30, %s1849_s5, %s1623_s21, %s1623_s21, %s1624_s24  }
 0x231 PF: > { %p1434_p2 = scmp.ge.s32.totalorder %s1601_s20, 2  ;;  %s1254_s26 = sand.u32 1, %s1581_s15  }
 0x232   : > { %s1255_s29 = scalar_lea.sflag [#allocation3], %s1254_s26 }
 0x233   : > { %p1431_p3 = pnand %p1434_p2, %p1697_p8 }
 0x235   : > { %1576 = dma.done.wait (!%p1431_p3), %s1255_s29, 256  }
 0x236   : > { %1578 = vsyncadd (!%p1431_p3), %s1255_s29, 4294967040  ;;  %s17_s20 = sadd.s32 1, %s1601_s20   ;;  %s1902_s15 = smov %s1585_s16 }
 0x237   : > { %p14_p5 = scmp.ge.s32.totalorder %s17_s20, 4   ;;  %s1903_s16 = smov %s1589_s17 }
 0x238   : > { %s1904_s17 = smov %s1703_s28  ;;  %s1905_s18 = smov %s1597_s19 }
 0x239   : > { %s1906_s19 = smov %s1908_s23  ;;  %16 = sbr.rel (!%p14_p5) target bundleno = 4 (0x4), region = 82 }
 0x240   :  { %1260 = vsyncpa [#allocation3], 1 }
 0x241   :  { %1262 = vsyncpa [#allocation3 + $0x1], 1 }

</bundles_post_ra>
